<compile_context>
chip_gen: v7x
topology: tpu7x:2x2x1
jax: 0.10.0
libtpu: 0.0.40
codegen_flags: <defaults>
</compile_context>

<pallas_src>
import jax
import jax.numpy as jnp
from jax.experimental import pallas as pl
from jax.experimental.pallas import tpu as pltpu

INPUT_DIM = 15
HIDDEN_DIM = 64
OUTPUT_DIM = 7
OUT_PAD = 8            # output lane width: full-array last dim (7 padded to 8 sublane-friendly)
TB_MAX = 4096          # max batch-tile rows; ~8 MiB double-buffered VMEM per step


def _round_up(n, m):
    return ((n + m - 1) // m) * m


def qnetwork_kernel(x_ref, w1_ref, b1_ref, w2_ref, b2_ref, w3_ref, b3_ref, o_ref):
    # fc1 + relu (f32 MXU; kernel is memory-bound so f32 costs nothing)
    h1 = jnp.dot(x_ref[...], w1_ref[...], preferred_element_type=jnp.float32) + b1_ref[...]
    h1 = jnp.maximum(h1, 0.0)
    # fc2 + relu
    h2 = jnp.dot(h1, w2_ref[...], preferred_element_type=jnp.float32) + b2_ref[...]
    h2 = jnp.maximum(h2, 0.0)
    # fc3 (no activation) -> narrow 8-lane output block
    o_ref[...] = (jnp.dot(h2, w3_ref[...], preferred_element_type=jnp.float32)
                  + b3_ref[...]).astype(o_ref.dtype)


def prepare_params(params):
    """One-time prep: pad fc3 weight/bias from 7 to 8 output lanes (f32 kept)."""
    return {
        "w1": params["w1"],
        "b1": params["b1"],
        "w2": params["w2"],
        "b2": params["b2"],
        "w3": jnp.pad(params["w3"], ((0, 0), (0, OUT_PAD - OUTPUT_DIM))),
        "b3": jnp.pad(params["b3"], ((0, 0), (0, OUT_PAD - OUTPUT_DIM))),
    }


def qnetwork_forward(x, prepared, tb_max=TB_MAX):
    """Fused forward pass of QNetwork in a single batch-tiled Pallas kernel.

    x: [B, INPUT_DIM] float32
    prepared: output of prepare_params (w3/b3 already padded to OUT_PAD lanes).
    """
    B = x.shape[0]

    # Batch tile: ~half the batch (>=2 grid steps for megacore on v7x), rounded
    # to 8 sublanes, capped at tb_max; pad B so tiles divide evenly.
    TB = max(8, min(tb_max, _round_up(pl.cdiv(B, 2), 8)))
    B_pad = _round_up(B, TB)
    x_p = jnp.pad(x, ((0, B_pad - B), (0, 0))) if B_pad != B else x
    grid = (B_pad // TB,)

    out = pl.pallas_call(
        qnetwork_kernel,
        out_shape=jax.ShapeDtypeStruct((B_pad, OUT_PAD), jnp.float32),
        grid=grid,
        in_specs=[
            # streamed: one batch tile per grid step (auto double-buffered)
            pl.BlockSpec((TB, INPUT_DIM), lambda i: (i, 0)),
            # resident: same block every step -> fetched once, stays in VMEM
            pl.BlockSpec((INPUT_DIM, HIDDEN_DIM), lambda i: (0, 0)),
            pl.BlockSpec((1, HIDDEN_DIM), lambda i: (0, 0)),
            pl.BlockSpec((HIDDEN_DIM, HIDDEN_DIM), lambda i: (0, 0)),
            pl.BlockSpec((1, HIDDEN_DIM), lambda i: (0, 0)),
            pl.BlockSpec((HIDDEN_DIM, OUT_PAD), lambda i: (0, 0)),
            pl.BlockSpec((1, OUT_PAD), lambda i: (0, 0)),
        ],
        out_specs=pl.BlockSpec((TB, OUT_PAD), lambda i: (i, 0)),
        compiler_params=pltpu.CompilerParams(
            dimension_semantics=("parallel",)),  # megacore sharding on v7x
    )(x_p, prepared["w1"], prepared["b1"], prepared["w2"], prepared["b2"],
      prepared["w3"], prepared["b3"])

    # Drop batch padding and the 1 padded output lane (8 -> 7): trivial traffic now.
    return out[:B, :OUTPUT_DIM]


def init_params(key):
    """Deterministic init mimicking nn.Linear's uniform(-1/sqrt(fan_in), 1/sqrt(fan_in))."""
    ks = jax.random.split(key, 6)

    def linear(kw, kb, fan_in, fan_out):
        bound = 1.0 / jnp.sqrt(jnp.float32(fan_in))
        # stored as [in, out] (transposed relative to PyTorch's [out, in])
        w = jax.random.uniform(kw, (fan_in, fan_out), jnp.float32, -bound, bound)
        b = jax.random.uniform(kb, (1, fan_out), jnp.float32, -bound, bound)
        return w, b

    w1, b1 = linear(ks[0], ks[1], INPUT_DIM, HIDDEN_DIM)
    w2, b2 = linear(ks[2], ks[3], HIDDEN_DIM, HIDDEN_DIM)
    w3, b3 = linear(ks[4], ks[5], HIDDEN_DIM, OUTPUT_DIM)
    return {"w1": w1, "b1": b1, "w2": w2, "b2": b2, "w3": w3, "b3": b3}


def reference_forward(x, p):
    # Pure f32 reference (the "true" module semantics).
    h1 = jnp.maximum(x @ p["w1"] + p["b1"], 0.0)
    h2 = jnp.maximum(h1 @ p["w2"] + p["b2"], 0.0)
    return h2 @ p["w3"] + p["b3"]


if __name__ == "__main__":
    key = jax.random.PRNGKey(0)
    kp, kx = jax.random.split(key)
    params = init_params(kp)
    prepared = prepare_params(params)   # one-time pad of w3/b3 (outside serving path)

    # Small serving-style batch (single grid step).
    batch = 8
    x = jax.random.normal(kx, (batch, INPUT_DIM), jnp.float32)
    out = jax.block_until_ready(qnetwork_forward(x, prepared))
    ref = reference_forward(x, params)
    assert out.shape == (batch, OUTPUT_DIM), out.shape
    assert jnp.allclose(out, ref, atol=2e-2, rtol=2e-2), "mismatch vs JAX reference (B=8)"

    # Ragged batch, multiple grid steps (exercises padding + pipelined tiles).
    batch2 = 300
    x2 = jax.random.normal(jax.random.fold_in(kx, 1), (batch2, INPUT_DIM), jnp.float32)
    out2 = jax.block_until_ready(qnetwork_forward(x2, prepared, tb_max=128))
    ref2 = reference_forward(x2, params)
    assert out2.shape == (batch2, OUTPUT_DIM), out2.shape
    assert jnp.allclose(out2, ref2, atol=2e-2, rtol=2e-2), "mismatch vs JAX reference (B=300)"

    # Larger batch with default tiles (two balanced grid steps -> both v7x cores).
    batch3 = 3000
    x3 = jax.random.normal(jax.random.fold_in(kx, 2), (batch3, INPUT_DIM), jnp.float32)
    out3 = jax.block_until_ready(qnetwork_forward(x3, prepared))
    ref3 = reference_forward(x3, params)
    assert out3.shape == (batch3, OUTPUT_DIM), out3.shape
    assert jnp.allclose(out3, ref3, atol=2e-2, rtol=2e-2), "mismatch vs JAX reference (B=3000)"

    print("KERNEL_OK")
</pallas_src>

<mosaic_0001>
module attributes {stable_mosaic.version = 11 : i64} {
  func.func @qnetwork_kernel(%arg0: i32, %arg1: memref<8x15xf32, #tpu.memory_space<vmem>>, %arg2: memref<15x64xf32, #tpu.memory_space<vmem>>, %arg3: memref<1x64xf32, #tpu.memory_space<vmem>>, %arg4: memref<64x64xf32, #tpu.memory_space<vmem>>, %arg5: memref<1x64xf32, #tpu.memory_space<vmem>>, %arg6: memref<64x8xf32, #tpu.memory_space<vmem>>, %arg7: memref<1x8xf32, #tpu.memory_space<vmem>>, %arg8: memref<8x8xf32, #tpu.memory_space<vmem>>) attributes {dimension_semantics = [#tpu.dimension_semantics<parallel>], iteration_bounds = array<i64: 1>, scalar_prefetch = 0 : i64, scratch_operands = 0 : i64, tpu.core_type = #tpu.core_type<tc>, window_params = [{transform_indices = @transform_0, window_bounds = array<i64: 8, 15>}, {pipeline_mode = #tpu.pipeline_mode<synchronous>, transform_indices = @transform_1, window_bounds = array<i64: 15, 64>}, {pipeline_mode = #tpu.pipeline_mode<synchronous>, transform_indices = @transform_2, window_bounds = array<i64: 1, 64>}, {pipeline_mode = #tpu.pipeline_mode<synchronous>, transform_indices = @transform_3, window_bounds = array<i64: 64, 64>}, {pipeline_mode = #tpu.pipeline_mode<synchronous>, transform_indices = @transform_4, window_bounds = array<i64: 1, 64>}, {pipeline_mode = #tpu.pipeline_mode<synchronous>, transform_indices = @transform_5, window_bounds = array<i64: 64, 8>}, {pipeline_mode = #tpu.pipeline_mode<synchronous>, transform_indices = @transform_6, window_bounds = array<i64: 1, 8>}, {transform_indices = @transform_7, window_bounds = array<i64: 8, 8>}]} {
    %c0 = arith.constant 0 : index
    %c0_0 = arith.constant 0 : index
    %0 = vector.load %arg1[%c0, %c0_0] : memref<8x15xf32, #tpu.memory_space<vmem>>, vector<8x15xf32>
    %c0_1 = arith.constant 0 : index
    %c0_2 = arith.constant 0 : index
    %1 = vector.load %arg2[%c0_1, %c0_2] : memref<15x64xf32, #tpu.memory_space<vmem>>, vector<15x64xf32>
    %cst = arith.constant dense<0.000000e+00> : vector<8x64xf32>
    %2 = tpu.matmul %0, %1, %cst {dimension_numbers = #tpu.dot_dimension_numbers<[1], [0], [0], [1], [0, 0, 1, 1], [], []>} : vector<8x15xf32>, vector<15x64xf32>, vector<8x64xf32> -> vector<8x64xf32>
    %c0_3 = arith.constant 0 : index
    %c0_4 = arith.constant 0 : index
    %3 = vector.load %arg3[%c0_3, %c0_4] : memref<1x64xf32, #tpu.memory_space<vmem>>, vector<1x64xf32>
    %4 = vector.broadcast %3 : vector<1x64xf32> to vector<8x64xf32>
    %5 = arith.addf %2, %4 : vector<8x64xf32>
    %cst_5 = arith.constant 0.000000e+00 : f32
    %6 = vector.broadcast %cst_5 : f32 to vector<8x64xf32>
    %7 = arith.maximumf %5, %6 : vector<8x64xf32>
    %c0_6 = arith.constant 0 : index
    %c0_7 = arith.constant 0 : index
    %8 = vector.load %arg4[%c0_6, %c0_7] : memref<64x64xf32, #tpu.memory_space<vmem>>, vector<64x64xf32>
    %cst_8 = arith.constant dense<0.000000e+00> : vector<8x64xf32>
    %9 = tpu.matmul %7, %8, %cst_8 {dimension_numbers = #tpu.dot_dimension_numbers<[1], [0], [0], [1], [0, 0, 1, 1], [], []>} : vector<8x64xf32>, vector<64x64xf32>, vector<8x64xf32> -> vector<8x64xf32>
    %c0_9 = arith.constant 0 : index
    %c0_10 = arith.constant 0 : index
    %10 = vector.load %arg5[%c0_9, %c0_10] : memref<1x64xf32, #tpu.memory_space<vmem>>, vector<1x64xf32>
    %11 = vector.broadcast %10 : vector<1x64xf32> to vector<8x64xf32>
    %12 = arith.addf %9, %11 : vector<8x64xf32>
    %cst_11 = arith.constant 0.000000e+00 : f32
    %13 = vector.broadcast %cst_11 : f32 to vector<8x64xf32>
    %14 = arith.maximumf %12, %13 : vector<8x64xf32>
    %c0_12 = arith.constant 0 : index
    %c0_13 = arith.constant 0 : index
    %15 = vector.load %arg6[%c0_12, %c0_13] : memref<64x8xf32, #tpu.memory_space<vmem>>, vector<64x8xf32>
    %cst_14 = arith.constant dense<0.000000e+00> : vector<8x8xf32>
    %16 = tpu.matmul %14, %15, %cst_14 {dimension_numbers = #tpu.dot_dimension_numbers<[1], [0], [0], [1], [0, 0, 1, 1], [], []>} : vector<8x64xf32>, vector<64x8xf32>, vector<8x8xf32> -> vector<8x8xf32>
    %c0_15 = arith.constant 0 : index
    %c0_16 = arith.constant 0 : index
    %17 = vector.load %arg7[%c0_15, %c0_16] : memref<1x8xf32, #tpu.memory_space<vmem>>, vector<1x8xf32>
    %18 = vector.broadcast %17 : vector<1x8xf32> to vector<8x8xf32>
    %19 = arith.addf %16, %18 : vector<8x8xf32>
    %c0_17 = arith.constant 0 : index
    %c0_18 = arith.constant 0 : index
    %20 = vector.load %arg8[%c0_17, %c0_18] : memref<8x8xf32, #tpu.memory_space<vmem>>, vector<8x8xf32>
    tpu.vector_store %arg8[%c0_17, %c0_18], %19 {strides = array<i32>} : memref<8x8xf32, #tpu.memory_space<vmem>>, vector<8x8xf32>,
    return
  }
  func.func @transform_0(%arg0: i32) -> (i32, i32) {
    %c0_i32 = arith.constant 0 : i32
    %c0_i32_0 = arith.constant 0 : i32
    return %arg0, %c0_i32 : i32, i32
  }
  func.func @transform_1(%arg0: i32) -> (i32, i32) {
    %c0_i32 = arith.constant 0 : i32
    %c0_i32_0 = arith.constant 0 : i32
    %c0_i32_1 = arith.constant 0 : i32
    return %c0_i32, %c0_i32_0 : i32, i32
  }
  func.func @transform_2(%arg0: i32) -> (i32, i32) {
    %c0_i32 = arith.constant 0 : i32
    %c0_i32_0 = arith.constant 0 : i32
    %c0_i32_1 = arith.constant 0 : i32
    return %c0_i32, %c0_i32_0 : i32, i32
  }
  func.func @transform_3(%arg0: i32) -> (i32, i32) {
    %c0_i32 = arith.constant 0 : i32
    %c0_i32_0 = arith.constant 0 : i32
    %c0_i32_1 = arith.constant 0 : i32
    return %c0_i32, %c0_i32_0 : i32, i32
  }
  func.func @transform_4(%arg0: i32) -> (i32, i32) {
    %c0_i32 = arith.constant 0 : i32
    %c0_i32_0 = arith.constant 0 : i32
    %c0_i32_1 = arith.constant 0 : i32
    return %c0_i32, %c0_i32_0 : i32, i32
  }
  func.func @transform_5(%arg0: i32) -> (i32, i32) {
    %c0_i32 = arith.constant 0 : i32
    %c0_i32_0 = arith.constant 0 : i32
    %c0_i32_1 = arith.constant 0 : i32
    return %c0_i32, %c0_i32_0 : i32, i32
  }
  func.func @transform_6(%arg0: i32) -> (i32, i32) {
    %c0_i32 = arith.constant 0 : i32
    %c0_i32_0 = arith.constant 0 : i32
    %c0_i32_1 = arith.constant 0 : i32
    return %c0_i32, %c0_i32_0 : i32, i32
  }
  func.func @transform_7(%arg0: i32) -> (i32, i32) {
    %c0_i32 = arith.constant 0 : i32
    %c0_i32_0 = arith.constant 0 : i32
    return %arg0, %c0_i32 : i32, i32
  }
}

</mosaic_0001>

<bundles_post_ra>
// kernel: tpu_custom_call.1
= control target key start
LH: loop header
LB: loop body
LE: loop exit
PB: predicated region body
PF: predicated region fallthrough
CT: control target
= control target key end

     0   :  { %12 = vsyncpa [#allocation3], 0  ;;  %s614_s0 = inlined_call_operand.hbm [shape: f32[8,15], index: 0, kind: input, shape index: {}]   ;;  %s615_s1 = inlined_call_operand.vmem [shape: f32[15,64], index: 1, kind: input, shape index: {}]   ;;  %s616_s2 = inlined_call_operand.vmem [shape: f32[1,64], index: 2, kind: input, shape index: {}]   ;;  %s617_s3 = inlined_call_operand.vmem [shape: f32[64,64], index: 3, kind: input, shape index: {}]   ;;  %s618_s4 = inlined_call_operand.vmem [shape: f32[1,64], index: 4, kind: input, shape index: {}]   ;;  %s619_s5 = inlined_call_operand.vmem [shape: f32[64,8], index: 5, kind: input, shape index: {}]   ;;  %s620_s6 = inlined_call_operand.vmem [shape: f32[1,8], index: 6, kind: input, shape index: {}]   ;;  %s621_s7 = inlined_call_operand.hbm [shape: f32[8,8], index: 7, kind: output, shape index: {}]  }
   0x1   :  { %13 = vsyncpa [#allocation4], 0  ;;  %s478_s24 = smov [#allocation2]   ;;  %s430_s28 = scalar_lea.hbm %s614_s0, 128 }
   0x2   :  { %s20_s25 = sshll.u32 %s478_s24, 4  ;;  %p431_p0 = scmp.ne.s32.totalorder %s614_s0, %s430_s28  ;;  %s21_s25 = int_to_ptr.vmem [resolvable:$true] %s20_s25 }
   0x3   :  { %p434_p1 = scmp.lt.u32.totalorder %s430_s28, %s614_s0 }
   0x5   :  { %p436_p2 = pnand %p434_p1, %p431_p0 }
   0x7   :  { %439 = shalt.err (!%p436_p2)
}
   0x8   :  { %s440_s10 = scalar_lea.vmem %s21_s25, 128  ;;  %p445_p4 = scmp.lt.s32.totalorder %s21_s25, %s21_s25 }
   0x9   :  { %p441_p3 = scmp.ne.s32.totalorder %s21_s25, %s440_s10  ;;  %p446_p5 = scmp.lt.s32.totalorder %s440_s10, %s440_s10 }
   0xb   :  { %p447_p6 = por %p446_p5, %p445_p4 }
   0xd   :  { %p448_p7 = pnand %p447_p6, %p441_p3 }
   0xf   :  { %451 = shalt.err (!%p448_p7)
}
  0x10   :  { %23 = dma.hbm_to_vmem [thread:$0]  %s614_s0, 128, %s21_s25, [#allocation3]  }
  0x11   :  { %474 = dma.done.wait [#allocation3], 128  }
  0x12   :  { %475 = vsyncadd [#allocation3], 4294967168  ;;  %v479_v0 = vmov 0.0|0.0   ;;  %vm480_vm0 = vmmov 0   ;;  %v481_v1 = vmov 0.0   ;;  %vm53_vm1 = vcmask 1046528  }
  0x13   :  { %396 = vmatprep.subr.bf16.mxu0 %v479_v0  ;;  %400 = vmatprep.subr.bf16.mxu1 %v479_v0  ;;  %v40_v2 = vld [vmem:[%s615_s1] sm:$0xff]  ;;  %v41_v3 = vld [vmem:[%s615_s1 + $0x8] sm:$0x7f]  ;;  %vm482_vm2 = vmmov 1   ;;  %v130_v7 = vld [vmem:[%s617_s3 + $0x10] sm:$0xff]  ;;  %vm49_vm4 = vcmask 121856  }
  0x14   :  { %355 = vmatprep.mubr.msk.f32.mxu0 %vm480_vm0, %v481_v1  ;;  %374 = vmatprep.mubr.msk.f32.mxu1 %vm480_vm0, %v481_v1  ;;  %vm398_vm3 = vmpackc.low %vm53_vm1, %vm482_vm2  ;;  %v397_v4 = vpack.c.bf16 %v41_v3, %v40_v2  ;;  %v128_v5 = vld [vmem:[%s617_s3] sm:$0xff]  ;;  %v129_v6 = vld [vmem:[%s617_s3 + $0x8] sm:$0xff]  ;;  %vm143_vm5 = vcmask 523264   ;;  %s483_s26 = smov [#allocation5]   ;;  %vm306_vm6 = vcmask 64512  }
  0x15   :  { %v401_v8 = vpack.c.bf16 %v129_v6, %v128_v5  ;;  %v131_v9 = vld [vmem:[%s617_s3 + $0x18] sm:$0xff]  ;;  %v39_v10 = vld [vmem:[#allocation2] sm:$0xff]  ;;  %v133_v13 = vld [vmem:[%s617_s3 + $0x28] sm:$0xff]  ;;  %s314_s27 = sshll.u32 %s483_s26, 4  ;;  %s315_s27 = int_to_ptr.vmem [resolvable:$true] %s314_s27 }
  0x16   :  { %399 = vmatpush3.bf16.msk.msra.mxu0 %vm398_vm3, %v397_v4  ;;  %v404_v11 = vpack.c.bf16 %v131_v9, %v130_v7  ;;  %v132_v12 = vld [vmem:[%s617_s3 + $0x20] sm:$0xff]  ;;  %v134_v15 = vld [vmem:[%s617_s3 + $0x30] sm:$0xff]  ;;  %v135_v16 = vld [vmem:[%s617_s3 + $0x38] sm:$0xff]  ;;  %p457_p9 = scmp.lt.s32.totalorder %s315_s27, %s315_s27 }
  0x17   :  { %402 = vmatpush3.bf16.msra.mxu1 %v401_v8  ;;  %412 = vmatprep.subr.bf16.mxu0 %v479_v0  ;;  %v407_v14 = vpack.c.bf16 %v133_v13, %v132_v12  ;;  %v410_v17 = vpack.c.bf16 %v135_v16, %v134_v15  ;;  %v218_v18 = vld [vmem:[%s619_s5] sm:$0xff]  ;;  %v219_v19 = vld [vmem:[%s619_s5 + $0x8] sm:$0xff]  ;;  %v220_v20 = vld [vmem:[%s619_s5 + $0x10] sm:$0xff] }
  0x18   :  { %403 = vmatprep.subr.bf16.mxu1 %v479_v0  ;;  %v413_v21 = vpack.c.bf16 %v219_v19, %v218_v18  ;;  %v221_v22 = vld [vmem:[%s619_s5 + $0x18] sm:$0xff]  ;;  %v222_v24 = vld [vmem:[%s619_s5 + $0x20] sm:$0xff]  ;;  %v223_v25 = vld [vmem:[%s619_s5 + $0x28] sm:$0xff] }
  0x19   :  { %356 = vmatmul.mubr.msk.f32.vlgmr.msra.gmra.mrb[0].mxu0 %vm49_vm4, %v39_v10  ;;  %v416_v23 = vpack.c.bf16 %v221_v22, %v220_v20  ;;  %v419_v26 = vpack.c.bf16 %v223_v25, %v222_v24  ;;  %v323_v27 = vld [vmem:[%s616_s2] ss:$0 sm:$0xff]  ;;  %v224_v32 = vld [vmem:[%s619_s5 + $0x30] sm:$0xff]  ;;  %v225_v33 = vld [vmem:[%s619_s5 + $0x38] sm:$0xff]  ;;  %s452_s5 = scalar_lea.vmem %s315_s27, 128 }
  0x1a   :  { %393 = vmatprep.mubr.msk.f32.mxu0 %vm480_vm0, %v481_v1  ;;  %414 = vmatpush3.bf16.msra.mxu0 %v413_v21  ;;  %v422_v34 = vpack.c.bf16 %v225_v33, %v224_v32  ;;  %v326_v35 = vld [vmem:[%s618_s4] ss:$0 sm:$0xff]  ;;  %p453_p8 = scmp.ne.s32.totalorder %s315_s27, %s452_s5  ;;  %p458_p10 = scmp.lt.s32.totalorder %s452_s5, %s452_s5 }
  0x1b   :  { %405 = vmatpush3.bf16.msra.mxu1 %v404_v11  ;;  %415 = vmatprep.subr.bf16.mxu0 %v479_v0  ;;  %v328_v40 = vld [vmem:[%s620_s6] ss:$0 sm:$0xff] }
  0x1c   :  { %406 = vmatprep.subr.bf16.mxu1 %v479_v0  ;;  %p459_p11 = por %p458_p10, %p457_p9 }
  0x1e   :  { %417 = vmatpush3.bf16.msra.mxu0 %v416_v23  ;;  %p460_p12 = pnand %p459_p11, %p453_p8 }
  0x1f   :  { %408 = vmatpush3.bf16.msra.mxu1 %v407_v14  ;;  %418 = vmatprep.subr.bf16.mxu0 %v479_v0 }
  0x20   :  { %409 = vmatprep.subr.bf16.mxu1 %v479_v0 }
  0x22   :  { %420 = vmatpush3.bf16.msra.mxu0 %v419_v26 }
  0x23   :  { %411 = vmatpush3.bf16.msra.mxu1 %v410_v17  ;;  %421 = vmatprep.subr.bf16.mxu0 %v479_v0 }
  0x26   :  { %423 = vmatpush3.bf16.msra.mxu0 %v422_v34 }
  0xec   :  { %v123_v28 = vpop.f32.mrb[0].mxu0 }
  0xed   :  { %v124_v29 = vadd.f32 %v323_v27, %v123_v28  ;;  %v357_v30 = vpop.f32.mrb[1].mxu0 }
  0xef   :  { %v127_v31 = vmax.f32 %v124_v29, 0.0 }
  0xf1   :  { %375 = vmatmul.mubr.msk.f32.vlgmr.msra.gmra.mrb[0].mxu1 %vm143_vm5, %v127_v31 }
 0x1c4   :  { %v213_v36 = vpop.f32.mrb[0].mxu1 }
 0x1c5   :  { %v214_v37 = vadd.f32 %v326_v35, %v213_v36  ;;  %v376_v38 = vpop.f32.mrb[1].mxu1 }
 0x1c7   :  { %v217_v39 = vmax.f32 %v214_v37, 0.0 }
 0x1c9   :  { %394 = vmatmul.mubr.msk.f32.vlgmr.msra.gmra.mrb[2].mxu0 %vm143_vm5, %v217_v39 }
 0x29c   :  { %v302_v41 = vpop.f32.mrb[2].mxu0 }
 0x29d   :  { %v303_v42 = vadd.f32 %v328_v40, %v302_v41  ;;  %v395_v43 = vpop.f32.mrb[3].mxu0 }
 0x29f   :  { %307 = vst.msk [vmem:[#allocation5] sm:$0xff] %vm306_vm6, %v303_v42 }
 0x2a0   :  { %463 = shalt.err (!%p460_p12)
}
 0x2a1   :  { %s464_s29 = scalar_lea.hbm %s621_s7, 128 }
 0x2a2   :  { %p465_p13 = scmp.ne.s32.totalorder %s621_s7, %s464_s29  ;;  %p468_p0 = scmp.lt.u32.totalorder %s464_s29, %s621_s7 }
 0x2a4   :  { %p470_p1 = pnand %p468_p0, %p465_p13 }
 0x2a6   :  { %473 = shalt.err (!%p470_p1)
}
 0x2a7   :  { %317 = dma.vmem_to_hbm [thread:$0]  %s315_s27, 128, %s621_s7, [#allocation4]  }
 0x2a8   :  { %476 = dma.done.wait [#allocation4], 128  }
 0x2a9   :  { %477 = vsyncadd [#allocation4], 4294967168 }
 0x2aa   :  { %321 = vsyncpa [#allocation3], 1 }
 0x2ab   :  { %322 = vsyncpa [#allocation4], 1 }

</bundles_post_ra>
